<compile_context>
chip_gen: v5e
topology: v5e:2x2
jax: 0.10.0
libtpu: 0.0.40
codegen_flags: <defaults>
</compile_context>

<pallas_src>
import functools

import jax
import jax.numpy as jnp
import numpy as np
from jax.experimental import pallas as pl
from jax.experimental.pallas import tpu as pltpu


def _round_up(v, m):
    return (v + m - 1) // m * m


def _tnn_kernel(x_ref, w_ref, b_ref, smat_ref, t_ref, leafw_ref, o_ref,
                *, depth, n_leaves):
    # logits[n, b] = sum_f W'[n, f] * x[b, f]  -> batch stays on the lane axis.
    logits = jax.lax.dot_general(
        w_ref[...], x_ref[...],
        dimension_numbers=(((1,), (1,)), ((), ())),
        preferred_element_type=jnp.float32)                        # (N, TB) f32
    # Steepness is already folded into W'/b'; elementwise math stays f32
    # (v5e has no bf16 VPU/EUP path).
    p = jax.nn.sigmoid(logits + b_ref[...])                        # (N, TB)
    # q[d*L + i, :] = p[node(d,i), :]     if leaf i goes LEFT at layer d
    #              = 1 - p[node(d,i), :]  if leaf i goes RIGHT at layer d
    q = jnp.dot(smat_ref[...], p,
                preferred_element_type=jnp.float32) + t_ref[...]   # (DL, TB)
    final = q[0:n_leaves, :]
    for d in range(1, depth):           # static python loop; depth is tiny
        final = final * q[d * n_leaves:(d + 1) * n_leaves, :]      # (L, TB)
    # leafw_ref holds sigmoid(leaves), hoisted out of the kernel.
    o_ref[...] = jnp.sum(final * leafw_ref[...], axis=0, keepdims=True)  # (1,TB)


def _build_routing(depth):
    """Static routing matrices encoding the PyTorch dict recursion.

    Leaf column order matches torch.stack(list(output_probs[depth-1].values()), 1):
    leaf i passes through node (i >> (depth - d)) at layer d and goes left iff
    bit (depth-1-d) of i is 0.
    """
    L = 2 ** depth
    N = 2 ** depth - 1
    S = np.zeros((N, depth * L), np.float32)
    t = np.zeros((1, depth * L), np.float32)
    for d in range(depth):
        off = 2 ** d - 1
        for i in range(L):
            node = i >> (depth - d)
            go_right = (i >> (depth - 1 - d)) & 1
            if go_right == 0:
                S[off + node, d * L + i] = 1.0
            else:
                S[off + node, d * L + i] = -1.0
                t[0, d * L + i] = 1.0
    return S, t


def tnn_forward(x, layer_weights, layer_biases, steepness, leaves, *, depth,
                batch_tile=4096):
    """Pallas forward of the tnn module.  x streams in its native dtype."""
    B, F = x.shape
    L = 2 ** depth
    N = L - 1
    DL = depth * L
    dtype = x.dtype
    itemsize = jnp.dtype(dtype).itemsize

    # Effective batch tile: multiple of 128 (lane-dense output), no larger than
    # needed, and capped so the "parallel" batch axis has >= 2 grid steps when
    # B allows (keeps both v7x TensorCores busy).
    tile = min(_round_up(batch_tile, 128), _round_up(B, 128))
    if B > 128:
        tile = min(tile, max(128, _round_up(B, 256) // 2))
    tile = max(tile, 128)
    n_steps = pl.cdiv(B, tile)
    B_ceil = n_steps * tile

    # Fold steepness into the per-node weights/biases:  (Wx+b)*s == (W*s)x + b*s.
    w_list = [w * s[:, None] for w, s in zip(layer_weights, steepness)]
    b_list = [b * s for b, s in zip(layer_biases, steepness)]
    w_all = jnp.concatenate(w_list, axis=0).astype(dtype)              # (N, F)
    b_all = jnp.concatenate(b_list).reshape(N, 1).astype(jnp.float32)  # (N, 1)

    S_np, t_np = _build_routing(depth)
    S_T = jnp.asarray(S_np.T)                                          # (DL, N)
    t_col = jnp.asarray(t_np.T)                                        # (DL, 1)
    # Hoist sigmoid(leaves) out of the kernel (constant across the grid).
    leaf_w = jax.nn.sigmoid(leaves.astype(jnp.float32)).reshape(L, 1)  # (L, 1)

    kernel = functools.partial(_tnn_kernel, depth=depth, n_leaves=L)

    cost = pl.CostEstimate(
        flops=2 * B_ceil * (F * N + N * DL + depth * L + L) + 2 * B_ceil * (N + DL),
        transcendentals=B_ceil * N,
        bytes_accessed=(B_ceil * F * itemsize + B_ceil * 4
                        + N * F * itemsize
                        + 4 * (N + DL * (N + 1) + L)),
    )

    out = pl.pallas_call(
        kernel,
        out_shape=jax.ShapeDtypeStruct((1, B_ceil), jnp.float32),
        grid_spec=pltpu.PrefetchScalarGridSpec(
            num_scalar_prefetch=0,
            grid=(n_steps,),
            in_specs=[
                pl.BlockSpec((tile, F), lambda i: (i, 0)),   # x tile (batch rows)
                pl.BlockSpec((N, F), lambda i: (0, 0)),      # W' = W*s  (resident)
                pl.BlockSpec((N, 1), lambda i: (0, 0)),      # b' = b*s  (resident)
                pl.BlockSpec((DL, N), lambda i: (0, 0)),     # routing signs S^T
                pl.BlockSpec((DL, 1), lambda i: (0, 0)),     # routing offsets t
                pl.BlockSpec((L, 1), lambda i: (0, 0)),      # sigmoid(leaves)
            ],
            out_specs=pl.BlockSpec((1, tile), lambda i: (0, i)),  # lane-dense
        ),
        compiler_params=pltpu.CompilerParams(
            dimension_semantics=("parallel",)),
        cost_estimate=cost,
    )(x, w_all, b_all, S_T, t_col, leaf_w)
    return out[0, :B]


def tnn_reference(x, layer_weights, layer_biases, steepness, leaves, *, depth):
    """Plain-JAX transcription of the PyTorch forward (dict recursion)."""
    layer_probs = {}
    for d in range(depth):
        z = jnp.dot(x, layer_weights[d].T,
                    precision=jax.lax.Precision.HIGHEST) + layer_biases[d]
        layer_probs[d] = jax.nn.sigmoid(z * steepness[d])
    output_probs = {}
    for d in range(depth):
        output_probs[d] = {}
        for no_l in range(2 ** d):
            father = str(no_l // 2)
            side = '_left' if no_l % 2 == 0 else '_right'
            base = output_probs[d - 1][father + side] if d != 0 else 1.0
            output_probs[d][f"{no_l}_left"] = base * layer_probs[d][:, no_l]
            output_probs[d][f"{no_l}_right"] = base * (1 - layer_probs[d][:, no_l])
    final = jnp.stack(list(output_probs[depth - 1].values()), axis=1)
    return (jax.nn.sigmoid(leaves) * final).sum(1)


def _make_params(depth, n_features, key):
    keys = jax.random.split(key, 3 * depth + 1)
    layer_weights = [0.1 * jax.random.normal(keys[3 * d], (2 ** d, n_features),
                                             dtype=jnp.float32)
                     for d in range(depth)]
    layer_biases = [0.1 * jax.random.normal(keys[3 * d + 1], (2 ** d,),
                                            dtype=jnp.float32)
                    for d in range(depth)]
    steepness = [jnp.maximum(jax.random.normal(keys[3 * d + 2], (2 ** d,),
                                               dtype=jnp.float32), 1.0)
                 for d in range(depth)]
    leaves = jax.random.normal(keys[-1], (2 ** depth,), dtype=jnp.float32)
    return layer_weights, layer_biases, steepness, leaves


if __name__ == "__main__":
    key = jax.random.PRNGKey(0)
    k_par3, k_x1, k_x2, k_par4, k_par5 = jax.random.split(key, 5)

    # Tolerances sit above any MXU matmul-precision ambiguity (bf16-pass vs
    # full f32) while still catching routing/ordering bugs (which are O(0.1)).
    TOL = 1e-2

    # --- depth=3, small batch (single padded tile), f32 streaming ---
    depth, n_features, batch = 3, 32, 16
    lw, lb, st, lv = _make_params(depth, n_features, k_par3)
    x = jax.random.normal(k_x1, (batch, n_features), dtype=jnp.float32)
    ref = jax.block_until_ready(
        tnn_reference(x, lw, lb, st, lv, depth=depth))
    out = jax.block_until_ready(
        tnn_forward(x, lw, lb, st, lv, depth=depth))
    assert out.shape == (batch,)
    np.testing.assert_allclose(np.asarray(out), np.asarray(ref),
                               rtol=TOL, atol=TOL)

    # --- depth=3, ragged batch spanning multiple grid steps (no jnp.pad) ---
    batch2 = 300
    x2 = jax.random.normal(k_x2, (batch2, n_features), dtype=jnp.float32)
    ref2 = jax.block_until_ready(
        tnn_reference(x2, lw, lb, st, lv, depth=depth))
    out2 = jax.block_until_ready(
        tnn_forward(x2, lw, lb, st, lv, depth=depth))
    assert out2.shape == (batch2,)
    np.testing.assert_allclose(np.asarray(out2), np.asarray(ref2),
                               rtol=TOL, atol=TOL)

    # --- x already bf16 in HBM: streams bf16 as-is, f32 accumulation ---
    out_bf16 = jax.block_until_ready(
        tnn_forward(x2.astype(jnp.bfloat16), lw, lb, st, lv, depth=depth))
    np.testing.assert_allclose(np.asarray(out_bf16), np.asarray(ref2),
                               rtol=5e-2, atol=5e-2)

    # --- routing fuzz checks at deeper trees (leaf-column ordering) ---
    for d_test, k_par, b_test in ((4, k_par4, 37), (5, k_par5, 50)):
        lw_d, lb_d, st_d, lv_d = _make_params(d_test, n_features, k_par)
        x_d = jax.random.normal(jax.random.PRNGKey(7 + d_test),
                                (b_test, n_features), dtype=jnp.float32)
        ref_d = jax.block_until_ready(
            tnn_reference(x_d, lw_d, lb_d, st_d, lv_d, depth=d_test))
        out_d = jax.block_until_ready(
            tnn_forward(x_d, lw_d, lb_d, st_d, lv_d, depth=d_test))
        np.testing.assert_allclose(np.asarray(out_d), np.asarray(ref_d),
                                   rtol=TOL, atol=TOL)

    print("KERNEL_OK")
</pallas_src>

<mosaic_0001>
module attributes {stable_mosaic.version = 11 : i64} {
  func.func @_tnn_kernel(%arg0: i32, %arg1: memref<128x32xf32, #tpu.memory_space<vmem>>, %arg2: memref<7x32xf32, #tpu.memory_space<vmem>>, %arg3: memref<7x1xf32, #tpu.memory_space<vmem>>, %arg4: memref<24x7xf32, #tpu.memory_space<vmem>>, %arg5: memref<24x1xf32, #tpu.memory_space<vmem>>, %arg6: memref<8x1xf32, #tpu.memory_space<vmem>>, %arg7: memref<1x128xf32, #tpu.memory_space<vmem>>) attributes {dimension_semantics = [#tpu.dimension_semantics<parallel>], iteration_bounds = array<i64: 1>, scalar_prefetch = 0 : i64, scratch_operands = 0 : i64, tpu.core_type = #tpu.core_type<tc>, window_params = [{transform_indices = @transform_0, window_bounds = array<i64: 128, 32>}, {pipeline_mode = #tpu.pipeline_mode<synchronous>, transform_indices = @transform_1, window_bounds = array<i64: 7, 32>}, {pipeline_mode = #tpu.pipeline_mode<synchronous>, transform_indices = @transform_2, window_bounds = array<i64: 7, 1>}, {pipeline_mode = #tpu.pipeline_mode<synchronous>, transform_indices = @transform_3, window_bounds = array<i64: 24, 7>}, {pipeline_mode = #tpu.pipeline_mode<synchronous>, transform_indices = @transform_4, window_bounds = array<i64: 24, 1>}, {pipeline_mode = #tpu.pipeline_mode<synchronous>, transform_indices = @transform_5, window_bounds = array<i64: 8, 1>}, {transform_indices = @transform_6, window_bounds = array<i64: 1, 128>}]} {
    %c0 = arith.constant 0 : index
    %c0_0 = arith.constant 0 : index
    %0 = vector.load %arg2[%c0, %c0_0] : memref<7x32xf32, #tpu.memory_space<vmem>>, vector<7x32xf32>
    %c0_1 = arith.constant 0 : index
    %c0_2 = arith.constant 0 : index
    %1 = vector.load %arg1[%c0_1, %c0_2] : memref<128x32xf32, #tpu.memory_space<vmem>>, vector<128x32xf32>
    %cst = arith.constant dense<0.000000e+00> : vector<7x128xf32>
    %2 = tpu.matmul %0, %1, %cst {dimension_numbers = #tpu.dot_dimension_numbers<[1], [1], [0], [0], [0, 0, 1, 0], [], []>} : vector<7x32xf32>, vector<128x32xf32>, vector<7x128xf32> -> vector<7x128xf32>
    %c0_3 = arith.constant 0 : index
    %c0_4 = arith.constant 0 : index
    %3 = vector.load %arg3[%c0_3, %c0_4] : memref<7x1xf32, #tpu.memory_space<vmem>>, vector<7x1xf32>
    %4 = vector.broadcast %3 : vector<7x1xf32> to vector<7x128xf32>
    %5 = arith.addf %2, %4 : vector<7x128xf32>
    %6 = arith.negf %5 : vector<7x128xf32>
    %7 = math.exp %6 : vector<7x128xf32>
    %cst_5 = arith.constant 1.000000e+00 : f32
    %8 = vector.broadcast %cst_5 : f32 to vector<7x128xf32>
    %9 = arith.addf %8, %7 : vector<7x128xf32>
    %10 = arith.divf %8, %9 : vector<7x128xf32>
    %c0_6 = arith.constant 0 : index
    %c0_7 = arith.constant 0 : index
    %11 = vector.load %arg4[%c0_6, %c0_7] : memref<24x7xf32, #tpu.memory_space<vmem>>, vector<24x7xf32>
    %cst_8 = arith.constant dense<0.000000e+00> : vector<24x128xf32>
    %12 = tpu.matmul %11, %10, %cst_8 {dimension_numbers = #tpu.dot_dimension_numbers<[1], [0], [0], [1], [0, 0, 1, 1], [], []>} : vector<24x7xf32>, vector<7x128xf32>, vector<24x128xf32> -> vector<24x128xf32>
    %c0_9 = arith.constant 0 : index
    %c0_10 = arith.constant 0 : index
    %13 = vector.load %arg5[%c0_9, %c0_10] : memref<24x1xf32, #tpu.memory_space<vmem>>, vector<24x1xf32>
    %14 = vector.broadcast %13 : vector<24x1xf32> to vector<24x128xf32>
    %15 = arith.addf %12, %14 : vector<24x128xf32>
    %16 = vector.extract_strided_slice %15 {offsets = [0, 0], sizes = [8, 128], strides = [1, 1]} : vector<24x128xf32> to vector<8x128xf32>
    %17 = vector.extract_strided_slice %15 {offsets = [8, 0], sizes = [8, 128], strides = [1, 1]} : vector<24x128xf32> to vector<8x128xf32>
    %18 = arith.mulf %16, %17 : vector<8x128xf32>
    %19 = vector.extract_strided_slice %15 {offsets = [16, 0], sizes = [8, 128], strides = [1, 1]} : vector<24x128xf32> to vector<8x128xf32>
    %20 = arith.mulf %18, %19 : vector<8x128xf32>
    %c0_11 = arith.constant 0 : index
    %c0_12 = arith.constant 0 : index
    %21 = vector.load %arg6[%c0_11, %c0_12] : memref<8x1xf32, #tpu.memory_space<vmem>>, vector<8x1xf32>
    %22 = vector.broadcast %21 : vector<8x1xf32> to vector<8x128xf32>
    %23 = arith.mulf %20, %22 : vector<8x128xf32>
    %cst_13 = arith.constant dense<0.000000e+00> : vector<128xf32>
    %24 = vector.multi_reduction <add>, %23, %cst_13 [0] : vector<8x128xf32> to vector<128xf32>
    %25 = vector.shape_cast %24 : vector<128xf32> to vector<1x128xf32>
    %c0_14 = arith.constant 0 : index
    %c0_15 = arith.constant 0 : index
    %26 = vector.load %arg7[%c0_14, %c0_15] : memref<1x128xf32, #tpu.memory_space<vmem>>, vector<1x128xf32>
    tpu.vector_store %arg7[%c0_14, %c0_15], %25 {strides = array<i32>} : memref<1x128xf32, #tpu.memory_space<vmem>>, vector<1x128xf32>,
    return
  }
  func.func @transform_0(%arg0: i32) -> (i32, i32) {
    %c0_i32 = arith.constant 0 : i32
    %c0_i32_0 = arith.constant 0 : i32
    return %arg0, %c0_i32 : i32, i32
  }
  func.func @transform_1(%arg0: i32) -> (i32, i32) {
    %c0_i32 = arith.constant 0 : i32
    %c0_i32_0 = arith.constant 0 : i32
    %c0_i32_1 = arith.constant 0 : i32
    return %c0_i32, %c0_i32_0 : i32, i32
  }
  func.func @transform_2(%arg0: i32) -> (i32, i32) {
    %c0_i32 = arith.constant 0 : i32
    %c0_i32_0 = arith.constant 0 : i32
    %c0_i32_1 = arith.constant 0 : i32
    return %c0_i32, %c0_i32_0 : i32, i32
  }
  func.func @transform_3(%arg0: i32) -> (i32, i32) {
    %c0_i32 = arith.constant 0 : i32
    %c0_i32_0 = arith.constant 0 : i32
    %c0_i32_1 = arith.constant 0 : i32
    return %c0_i32, %c0_i32_0 : i32, i32
  }
  func.func @transform_4(%arg0: i32) -> (i32, i32) {
    %c0_i32 = arith.constant 0 : i32
    %c0_i32_0 = arith.constant 0 : i32
    %c0_i32_1 = arith.constant 0 : i32
    return %c0_i32, %c0_i32_0 : i32, i32
  }
  func.func @transform_5(%arg0: i32) -> (i32, i32) {
    %c0_i32 = arith.constant 0 : i32
    %c0_i32_0 = arith.constant 0 : i32
    %c0_i32_1 = arith.constant 0 : i32
    return %c0_i32, %c0_i32_0 : i32, i32
  }
  func.func @transform_6(%arg0: i32) -> (i32, i32) {
    %c0_i32 = arith.constant 0 : i32
    %c0_i32_0 = arith.constant 0 : i32
    return %c0_i32, %arg0 : i32, i32
  }
}

</mosaic_0001>

<bundles_post_ra>
// kernel: tpu_custom_call.1
= control target key start
LH: loop header
LB: loop body
LE: loop exit
PB: predicated region body
PF: predicated region fallthrough
CT: control target
= control target key end

     0   :  { %vm47_vm0 = vcmask 261120   ;;  %s420_s0 = inlined_call_operand.vmem [shape: f32[16,32], index: 0, kind: input, shape index: {}]   ;;  %s421_s1 = inlined_call_operand.vmem [shape: f32[7,32], index: 1, kind: input, shape index: {}]   ;;  %s422_s2 = inlined_call_operand.vmem [shape: f32[7,1], index: 2, kind: input, shape index: {}]   ;;  %s423_s3 = inlined_call_operand.vmem [shape: f32[24,7], index: 3, kind: input, shape index: {}]   ;;  %s424_s4 = inlined_call_operand.vmem [shape: f32[24,1], index: 4, kind: input, shape index: {}]   ;;  %s425_s5 = inlined_call_operand.vmem [shape: f32[8,1], index: 5, kind: input, shape index: {}]   ;;  %s426_s6 = inlined_call_operand.hbm [shape: f32[1,128], index: 6, kind: output, shape index: {}]  }
   0x1   :  { %v40_v0 = vld [vmem:[%s420_s0 + $0x78] sm:$0xff]  ;;  %v39_v1 = vld [vmem:[%s420_s0 + $0x70] sm:$0xff] }
   0x2   :  { %231 = vmatpush.xpose.msk.msra.mxu0 %vm47_vm0, %v40_v0 }
   0x3   :  { %11 = vsyncpa [#allocation3], 0  ;;  %v38_v2 = vld [vmem:[%s420_s0 + $0x68] sm:$0xff]  ;;  %v37_v3 = vld [vmem:[%s420_s0 + $0x60] sm:$0xff]  ;;  %v288_v10 = vmov 0   ;;  %vm169_vm4 = vcmask 1046528  }
   0x4   :  { %v36_v4 = vld [vmem:[%s420_s0 + $0x58] sm:$0xff]  ;;  %v35_v5 = vld [vmem:[%s420_s0 + $0x50] sm:$0xff]  ;;  %v34_v6 = vld [vmem:[%s420_s0 + $0x48] sm:$0xff]  ;;  %255 = vset.pattern.permute.xlu0 %v288_v10  ;;  %256 = vset.pattern.permute.xlu1 %v288_v10  ;;  %vm159_vm6 = vcmask 56320   ;;  %s289_s18 = smov [#allocation2]   ;;  %s222_s21 = sshll.u32 %s426_s6, 4  ;;  %s223_s21 = int_to_ptr.hbm [resolvable:$true] %s222_s21 }
   0x5   :  { %v33_v7 = vld [vmem:[%s420_s0 + $0x40] sm:$0xff]  ;;  %v32_v8 = vld [vmem:[%s420_s0 + $0x38] sm:$0xff]  ;;  %v31_v11 = vld [vmem:[%s420_s0 + $0x30] sm:$0xff]  ;;  %257 = vset.pattern.permute.xlu2 %v288_v10 }
   0x6   :  { %232 = vmatpush.xpose.msk.msra.mxu0 %vm47_vm0, %v39_v1  ;;  %v41_v9 = vld [vmem:[%s422_s2] sm:$0x7f]  ;;  %v30_v12 = vld [vmem:[%s420_s0 + $0x28] sm:$0xff]  ;;  %v28_v15 = vld [vmem:[%s420_s0 + $0x18] sm:$0xff] }
   0x7   :  { %44 = vperm.xlu0 %255, %v41_v9   ;;  %v141_v13 = vld [vmem:[%s424_s4] sm:$0xff]  ;;  %v27_v16 = vld [vmem:[%s420_s0 + $0x10] sm:$0xff]  ;;  %v26_v17 = vld [vmem:[%s420_s0 + $0x8] sm:$0xff] }
   0x8   :  { %v29_v14 = vld [vmem:[%s420_s0 + $0x20] sm:$0xff]  ;;  %v142_v24 = vld [vmem:[%s424_s4 + $0x8] sm:$0xff]  ;;  %v143_v27 = vld [vmem:[%s424_s4 + $0x10] sm:$0xff] }
   0x9   :  { %v25_v18 = vld [vmem:[%s420_s0] sm:$0xff]  ;;  %151 = vperm.xlu1 %256, %v142_v24   ;;  %v139_v40 = vld [vmem:[%s423_s3 + $0x8] sm:$0xff]  ;;  %v140_v41 = vld [vmem:[%s423_s3 + $0x10] sm:$0xff] }
   0xa   :  { %233 = vmatpush.xpose.msk.msra.mxu0 %vm47_vm0, %v38_v2  ;;  %v24_v19 = vld [vmem:[%s421_s1] sm:$0x7f] }
   0xb   :  { %v201_v28 = vld [vmem:[%s425_s5] sm:$0xff] }
   0xc   :  { %204 = vperm.xlu2 %257, %v201_v28   ;;  %v138_v38 = vld [vmem:[%s423_s3] sm:$0xff]  ;;  %s220_s3 = sshll.u32 %s289_s18, 4  ;;  %s221_s3 = int_to_ptr.vmem [resolvable:$true] %s220_s3 }
   0xe   :  { %234 = vmatpush.xpose.msk.msra.mxu0 %vm47_vm0, %v37_v3 }
   0xf   :  { %146 = vperm.xlu0 %255, %v141_v13  }
  0x11   :  { %156 = vperm.xlu1 %256, %v143_v27  }
  0x12   :  { %235 = vmatpush.xpose.msk.msra.mxu0 %vm47_vm0, %v36_v4 }
  0x16   :  { %236 = vmatpush.xpose.msk.msra.mxu0 %vm47_vm0, %v35_v5 }
  0x1a   :  { %237 = vmatpush.xpose.msk.msra.mxu0 %vm47_vm0, %v34_v6 }
  0x1e   :  { %238 = vmatpush.xpose.msk.msra.mxu0 %vm47_vm0, %v33_v7 }
  0x22   :  { %239 = vmatpush.xpose.msk.msra.mxu0 %vm47_vm0, %v32_v8 }
  0x26   :  { %240 = vmatpush.xpose.msk.msra.mxu0 %vm47_vm0, %v31_v11 }
  0x2a   :  { %241 = vmatpush.xpose.msk.msra.mxu0 %vm47_vm0, %v30_v12 }
  0x2e   :  { %242 = vmatpush.xpose.msk.msra.mxu0 %vm47_vm0, %v29_v14 }
  0x32   :  { %243 = vmatpush.xpose.msk.msra.mxu0 %vm47_vm0, %v28_v15 }
  0x36   :  { %244 = vmatpush.xpose.msk.msra.mxu0 %vm47_vm0, %v27_v16 }
  0x3a   :  { %245 = vmatpush.xpose.msk.msra.mxu0 %vm47_vm0, %v26_v17 }
  0x3e   :  { %246 = vmatpush.xpose.msk.msra.mxu0 %vm47_vm0, %v25_v18 }
  0x41   :  { %247 = vmatmul.msk.f32.vlgmr.msra.gmra.mxu0 %vm47_vm0, %v24_v19 }
  0x66   :  { %v205_v52 = vpop.permute.xlu2 %204 }
  0x79   :  { %v45_v20 = vpop.permute.xlu0 %44 }
  0x7b   :  { %v152_v43 = vpop.permute.xlu1 %151 }
  0x81   :  { %v147_v46 = vpop.permute.xlu0 %146 }
  0x83   :  { %v157_v48 = vpop.permute.xlu1 %156 }
  0xbe   :  { %v116_v21 = vpop.f32.mrf.mxu0 }
  0xbf   :  { %v117_v22 = vadd.f32 %v116_v21, %v45_v20 }
  0xc1   :  { %v248_v23 = vmul.f32 -1.442695, %v117_v22 }
  0xc3   :  { %258 = vpow2.f32 %v248_v23 }
  0xc9   :  { %v259_v25 = vpop.eup %258 }
  0xca   :  { %v122_v26 = vadd.f32 1.0, %v259_v25 }
  0xcc   :  { %260 = vrcp.f32 %v122_v26  ;;  %v134_v32 = vand.u32 2147483648, %v122_v26  ;;  %v132_v34 = vand.u32 2147483647, %v122_v26  ;;  %vm128_vm2 = vweird.f32 %v122_v26 }
  0xce   :  { %v135_v36 = vor.u32 1.1754944e-38, %v134_v32  ;;  %vm133_vm5 = vcmp.eq.f32.partialorder %v132_v34, 8.507059e+37 }
  0xd2   :  { %v261_v29 = vpop.eup %260 }
  0xd3   :  { %v124_v30 = vmul.f32 %v261_v29, %v122_v26  ;;  %vm129_vm1 = vweird.f32 %v261_v29 }
  0xd4   :  { %vm130_vm3 = vmor %vm128_vm2, %vm129_vm1 }
  0xd5   :  { %v125_v31 = vsub.f32 1.0, %v124_v30 }
  0xd7   :  { %v126_v33 = vmul.f32 %v261_v29, %v125_v31 }
  0xd9   :  { %v127_v35 = vadd.f32 %v261_v29, %v126_v33 }
  0xdb   :  { %v131_v37 = vsel %vm130_vm3, %v261_v29, %v127_v35 }
  0xdc   :  { %v136_v39 = vsel %vm133_vm5, %v135_v36, %v131_v37 }
  0xdd   :  { %249 = vmatpush.msk.msra.mxu1 %vm169_vm4, %v136_v39 }
  0xde   :  { %250 = vmatmul.msk.f32.vlgmr.msra.gmra.mxu1 %vm159_vm6, %v138_v38 }
  0xe6   :  { %251 = vmatmul.msk.f32.gmra.mxu1 %vm159_vm6, %v139_v40 }
  0xee   :  { %252 = vmatmul.msk.f32.gmra.mxu1 %vm159_vm6, %v140_v41 }
 0x15b   :  { %v190_v42 = vpop.f32.mrf.mxu1 }
 0x15c   :  { %v191_v47 = vadd.f32 %v190_v42, %v147_v46 }
 0x163   :  { %v193_v44 = vpop.f32.mrf.mxu1 }
 0x164   :  { %v194_v45 = vadd.f32 %v193_v44, %v152_v43 }
 0x166   :  { %v199_v50 = vmul.f32 %v194_v45, %v191_v47 }
 0x16b   :  { %v196_v49 = vpop.f32.mrf.mxu1 }
 0x16c   :  { %v197_v51 = vadd.f32 %v196_v49, %v157_v48 }
 0x16e   :  { %v200_v53 = vmul.f32 %v199_v50, %v197_v51 }
 0x170   :  { %v207_v54 = vmul.f32 %v205_v52, %v200_v53 }
 0x172   :  { %v208_v55 = vrot.slane %v207_v54, 4 }
 0x174   :  { %v209_v56 = vadd.f32 %v208_v55, %v207_v54 }
 0x176   :  { %v210_v57 = vrot.slane %v209_v56, 2 }
 0x178   :  { %v211_v58 = vadd.f32 %v210_v57, %v209_v56 }
 0x17a   :  { %v212_v59 = vrot.slane %v211_v58, 1 }
 0x17c   :  { %v213_v60 = vadd.f32 %v212_v59, %v211_v58 }
 0x17e   :  { %214 = vst [vmem:[#allocation2] sm:$0x1] %v213_v60 }
 0x17f   :  { %225 = dma.vmem_to_hbm [thread:$0]  %s221_s3, 16, %s223_s21, [#allocation3]  }
 0x180   :  { %286 = dma.done.wait [#allocation3], 16  }
 0x181   :  { %287 = vsyncadd [#allocation3], 4294967280 }
 0x182   :  { %230 = vsyncpa [#allocation3], 1 }

</bundles_post_ra>
